<compile_context>
chip_gen: v7x
topology: tpu7x:2x2x1
jax: 0.10.0
libtpu: 0.0.40
codegen_flags: <defaults>
</compile_context>

<pallas_src>
import functools

import jax
import jax.numpy as jnp
from jax.experimental import pallas as pl
from jax.experimental.pallas import tpu as pltpu


def _round_up(x, m):
    return -(-x // m) * m


def _gcn_layer_kernel(adj_ref, h_ref, normr_ref, wb_ref, out_ref, acc_ref, *, fout):
    # adj_ref : (TM, TK)   adjacency tile (int8 / bf16 / f32 as stored upstream)
    # h_ref   : (1, TK)    f32  -- precomputed (feat * norm)^T slice for this k
    # normr_ref: (TM, 1)   f32  -- norm for the rows of this tile
    # wb_ref  : (2*Fout,)  f32 SMEM -- [W[0,0..Fout-1], b[0..Fout-1]]
    # out_ref : (TM, Fout)
    # acc_ref : (TM, 1)    f32 scratch accumulator (persists over k)
    k = pl.program_id(1)

    @pl.when(k == 0)
    def _():
        acc_ref[...] = jnp.zeros_like(acc_ref)

    # Aggregation over this neighbor slice: VPU widen + broadcast-multiply,
    # XLU lane reduce.  (Fin=1 makes A @ (norm*feat) a 1-wide matmul -> pure
    # MXU fill/drain latency, so we stay off the MXU entirely.)
    # NOTE(v7x): a compare+select mask path would shave ~1 VALU op/vreg but
    # assumes a strictly binary adjacency; convert+multiply is exact for
    # weighted adjacencies too.
    contrib = adj_ref[...].astype(jnp.float32) * h_ref[...]        # (TM, TK)
    acc_ref[...] += jnp.sum(contrib, axis=-1, keepdims=True)       # (TM, 1)

    @pl.when(k == pl.num_programs(1) - 1)
    def _():
        agg = acc_ref[...] * normr_ref[...]                        # post-normalize
        # K=1 linear layer: per-output-column broadcast mul-add from SMEM scalars.
        cols = [agg * wb_ref[j] + wb_ref[fout + j] for j in range(fout)]
        out_ref[...] = jnp.concatenate(cols, axis=-1).astype(out_ref.dtype)


def gcn_layer(adj, feat, norm, weight, bias):
    """One GCN layer (norm * (A @ (norm * feat))) @ W + b, specialized to Fin=1.

    `adj` is used in whatever dtype the caller stores it (int8 recommended for
    0/1 graphs); no dtype conversion happens in the wrapper.
    """
    n = adj.shape[0]
    fin, fout = weight.shape
    assert fin == 1 and feat.shape[-1] == 1, (
        "kernel specialized to in_feats=1 (the only path GCNDataset.forward uses)")
    # TODO(synk): general Fin (gcnLayer2, 3->1) would need an MXU path; it is
    #             constructed by the module but never called by forward().

    itemsize = jnp.dtype(adj.dtype).itemsize

    # ---- tile sizing -------------------------------------------------------
    # Column (lane / reduction) tile: multiple of 128, capped at 2048.
    tk = min(2048, _round_up(n, 128))
    np_cols = _round_up(n, tk)

    # Row tile: ~1 MiB of adjacency per (TM, TK) tile, capped so the widened
    # f32 product temporary stays a few MiB, multiple of 32 (sub-32-bit sublane
    # packing), and capped so the parallel row axis keeps >= 8 blocks.
    target_adj_bytes = 1 << 20
    max_tile_elems = 1 << 20                      # f32 temp <= 4 MiB
    tm = target_adj_bytes // (tk * itemsize)
    tm = min(tm, max_tile_elems // tk)
    tm = max(32, (tm // 32) * 32)
    rows_cap = max(32, ((_round_up(n, 32) // 8) // 32) * 32)
    tm = min(tm, rows_cap)
    np_rows = _round_up(n, tm)

    pad_r, pad_c = np_rows - n, np_cols - n
    adj_p = adj
    if pad_r or pad_c:
        # NOTE: padding is one extra pass over the adjacency; producers that
        # care should store it already padded to (np_rows, np_cols).
        adj_p = jnp.pad(adj, ((0, pad_r), (0, pad_c)))

    # Precompute h = feat * norm once (O(N)), streamed as a (1, Np) f32 row.
    h = (feat.astype(jnp.float32) * norm.astype(jnp.float32)).reshape(1, n)
    if pad_c:
        h = jnp.pad(h, ((0, 0), (0, pad_c)))
    norm_rows = norm.astype(jnp.float32).reshape(n, 1)
    if pad_r:
        norm_rows = jnp.pad(norm_rows, ((0, pad_r), (0, 0)))

    # 6 scalars -> SMEM (flat so 1-D SMEM padding stays tiny).
    wb = jnp.concatenate(
        [weight.reshape(-1), bias.reshape(-1)]).astype(jnp.float32)     # (2*Fout,)

    grid = (np_rows // tm, np_cols // tk)
    kernel = functools.partial(_gcn_layer_kernel, fout=fout)

    cost = pl.CostEstimate(
        flops=2 * n * n + 4 * n * fout,
        transcendentals=0,
        bytes_accessed=n * n * itemsize + 4 * n * (2 + fout))

    out = pl.pallas_call(
        kernel,
        out_shape=jax.ShapeDtypeStruct((np_rows, fout), jnp.float32),
        grid_spec=pltpu.PrefetchScalarGridSpec(
            num_scalar_prefetch=0,
            grid=grid,
            in_specs=[
                pl.BlockSpec((tm, tk), lambda i, k: (i, k)),          # adj tile
                pl.BlockSpec((1, tk), lambda i, k: (0, k)),           # h row slice
                pl.BlockSpec((tm, 1), lambda i, k: (i, 0)),           # row norms
                pl.BlockSpec(memory_space=pltpu.MemorySpace.SMEM),    # [W; b]
            ],
            out_specs=pl.BlockSpec((tm, fout), lambda i, k: (i, 0)),
            scratch_shapes=[pltpu.VMEM((tm, 1), jnp.float32)],        # accumulator
        ),
        compiler_params=pltpu.CompilerParams(
            dimension_semantics=("parallel", "arbitrary"),
            vmem_limit_bytes=32 << 20),
        cost_estimate=cost,
    )(adj_p, h, norm_rows, wb)

    return out[:n] if pad_r else out


class GCNDatasetPallas:
    """Mirrors GCNDataset: two GCN layers hard-coded to 1->3 and 3->1 (exactly
    as the PyTorch module does, ignoring in_feats/out_feats); forward runs only
    layer 1 and returns its logits."""

    def __init__(self, in_feats, out_feats, num_parts, key):
        k1, k2 = jax.random.split(key)

        def xavier(k, fan_in, fan_out):
            limit = (6.0 / (fan_in + fan_out)) ** 0.5
            return jax.random.uniform(k, (fan_in, fan_out), jnp.float32,
                                      minval=-limit, maxval=limit)

        self.w1 = xavier(k1, 1, 3)
        self.b1 = jnp.zeros((1, 3), jnp.float32)
        self.w2 = xavier(k2, 3, 1)          # held for fidelity; unused in forward
        self.b2 = jnp.zeros((1, 1), jnp.float32)

    def forward(self, subgraph, feat, norm, send_map=None, recv_map=None,
                rank=0, size=1):
        # GCNDataset.forward only runs gcnLayer1 and returns its logits.
        # TODO(synk): send_map/recv_map/rank/size halo exchange not implemented.
        return gcn_layer(subgraph, feat, norm, self.w1, self.b1)


def _reference(adj_f32, feat, norm, w, b):
    h = feat * norm
    agg = adj_f32 @ h
    agg = agg * norm
    return agg @ w + b


if __name__ == "__main__":
    key = jax.random.PRNGKey(0)
    k_adj, k_feat, k_model = jax.random.split(key, 3)

    # Nodes in the (single-partition) subgraph.  N=200 exercises both row and
    # column padding plus a multi-step "parallel" row grid.
    N = 200

    # Small symmetric random graph with self-loops.  The 0/1 adjacency is
    # stored as int8 UPSTREAM (exact, 4x fewer HBM bytes than f32); the kernel
    # wrapper performs no dtype conversion.
    rand = jax.random.uniform(k_adj, (N, N))
    adj_f32 = (rand > 0.95).astype(jnp.float32)
    adj_f32 = jnp.maximum(adj_f32, adj_f32.T)                    # symmetrize
    adj_f32 = adj_f32.at[jnp.arange(N), jnp.arange(N)].set(1.0)  # self loops
    adj_i8 = adj_f32.astype(jnp.int8)                            # storage dtype

    deg = adj_f32.sum(axis=1, keepdims=True)
    norm = 1.0 / jnp.sqrt(deg)                                   # (N, 1)
    feat = jax.random.normal(k_feat, (N, 1), jnp.float32)        # in_feats = 1

    model = GCNDatasetPallas(in_feats=1, out_feats=1, num_parts=1, key=k_model)

    logits = model.forward(adj_i8, feat, norm, send_map=None, recv_map=None,
                           rank=0, size=1)
    logits = jax.block_until_ready(logits)

    ref = _reference(adj_f32, feat, norm, model.w1, model.b1)
    assert logits.shape == (N, 3), logits.shape
    assert jnp.allclose(logits, ref, atol=1e-4, rtol=1e-4), \
        float(jnp.max(jnp.abs(logits - ref)))

    print("KERNEL_OK")
</pallas_src>

<mosaic_0001>
module attributes {stable_mosaic.version = 11 : i64} {
  func.func @_gcn_layer_kernel(%arg0: i32, %arg1: i32, %arg2: memref<32x256xi8, #tpu.memory_space<vmem>>, %arg3: memref<1x256xf32, #tpu.memory_space<vmem>>, %arg4: memref<32x1xf32, #tpu.memory_space<vmem>>, %arg5: memref<6xf32, #tpu.memory_space<smem>>, %arg6: memref<32x3xf32, #tpu.memory_space<vmem>>, %arg7: memref<32x1xf32, #tpu.memory_space<vmem>>) attributes {dimension_semantics = [#tpu.dimension_semantics<parallel>, #tpu.dimension_semantics<arbitrary>], iteration_bounds = array<i64: 7, 1>, scalar_prefetch = 0 : i64, scratch_operands = 1 : i64, tpu.core_type = #tpu.core_type<tc>, window_params = [{transform_indices = @transform_0, window_bounds = array<i64: 32, 256>}, {transform_indices = @transform_1, window_bounds = array<i64: 1, 256>}, {transform_indices = @transform_2, window_bounds = array<i64: 32, 1>}, {transform_indices = @transform_3, window_bounds = array<i64: 6>}, {transform_indices = @transform_4, window_bounds = array<i64: 32, 3>}]} {
    %c0_i32 = arith.constant 0 : i32
    %0 = arith.cmpi eq, %arg1, %c0_i32 : i32
    %1 = arith.extui %0 : i1 to i32
    %c0_i32_0 = arith.constant 0 : i32
    %2 = arith.cmpi ne, %1, %c0_i32_0 : i32
    scf.if %2 {
      %cst_10 = arith.constant 0.000000e+00 : f32
      %16 = vector.broadcast %cst_10 : f32 to vector<32x1xf32>
      %c0_11 = arith.constant 0 : index
      %c0_12 = arith.constant 0 : index
      %17 = vector.load %arg7[%c0_11, %c0_12] : memref<32x1xf32, #tpu.memory_space<vmem>>, vector<32x1xf32>
      tpu.vector_store %arg7[%c0_11, %c0_12], %16 {strides = array<i32>} : memref<32x1xf32, #tpu.memory_space<vmem>>, vector<32x1xf32>,
    } else {
    }
    %c0 = arith.constant 0 : index
    %c0_1 = arith.constant 0 : index
    %3 = vector.load %arg2[%c0, %c0_1] : memref<32x256xi8, #tpu.memory_space<vmem>>, vector<32x256xi8>
    %4 = arith.sitofp %3 : vector<32x256xi8> to vector<32x256xf32>
    %c0_2 = arith.constant 0 : index
    %c0_3 = arith.constant 0 : index
    %5 = vector.load %arg3[%c0_2, %c0_3] : memref<1x256xf32, #tpu.memory_space<vmem>>, vector<1x256xf32>
    %6 = vector.broadcast %5 : vector<1x256xf32> to vector<32x256xf32>
    %7 = arith.mulf %4, %6 : vector<32x256xf32>
    %c0_4 = arith.constant 0 : index
    %c0_5 = arith.constant 0 : index
    %8 = vector.load %arg7[%c0_4, %c0_5] : memref<32x1xf32, #tpu.memory_space<vmem>>, vector<32x1xf32>
    %cst = arith.constant dense<0.000000e+00> : vector<32xf32>
    %9 = vector.multi_reduction <add>, %7, %cst [1] : vector<32x256xf32> to vector<32xf32>
    %10 = vector.shape_cast %9 : vector<32xf32> to vector<32x1xf32>
    %11 = arith.addf %8, %10 : vector<32x1xf32>
    %c0_6 = arith.constant 0 : index
    %c0_7 = arith.constant 0 : index
    %12 = vector.load %arg7[%c0_6, %c0_7] : memref<32x1xf32, #tpu.memory_space<vmem>>, vector<32x1xf32>
    tpu.vector_store %arg7[%c0_6, %c0_7], %11 {strides = array<i32>} : memref<32x1xf32, #tpu.memory_space<vmem>>, vector<32x1xf32>,
    %c0_i32_8 = arith.constant 0 : i32
    %13 = arith.cmpi eq, %arg1, %c0_i32_8 : i32
    %14 = arith.extui %13 : i1 to i32
    %c0_i32_9 = arith.constant 0 : i32
    %15 = arith.cmpi ne, %14, %c0_i32_9 : i32
    scf.if %15 {
      %c0_10 = arith.constant 0 : index
      %c0_11 = arith.constant 0 : index
      %16 = vector.load %arg7[%c0_10, %c0_11] : memref<32x1xf32, #tpu.memory_space<vmem>>, vector<32x1xf32>
      %c0_12 = arith.constant 0 : index
      %c0_13 = arith.constant 0 : index
      %17 = vector.load %arg4[%c0_12, %c0_13] : memref<32x1xf32, #tpu.memory_space<vmem>>, vector<32x1xf32>
      %18 = arith.mulf %16, %17 : vector<32x1xf32>
      %c0_14 = arith.constant 0 : index
      %19 = memref.load %arg5[%c0_14] : memref<6xf32, #tpu.memory_space<smem>>
      %20 = vector.broadcast %19 : f32 to vector<32x1xf32>
      %21 = arith.mulf %18, %20 : vector<32x1xf32>
      %c3 = arith.constant 3 : index
      %22 = memref.load %arg5[%c3] : memref<6xf32, #tpu.memory_space<smem>>
      %23 = vector.broadcast %22 : f32 to vector<32x1xf32>
      %24 = arith.addf %21, %23 : vector<32x1xf32>
      %c1 = arith.constant 1 : index
      %25 = memref.load %arg5[%c1] : memref<6xf32, #tpu.memory_space<smem>>
      %26 = vector.broadcast %25 : f32 to vector<32x1xf32>
      %27 = arith.mulf %18, %26 : vector<32x1xf32>
      %c4 = arith.constant 4 : index
      %28 = memref.load %arg5[%c4] : memref<6xf32, #tpu.memory_space<smem>>
      %29 = vector.broadcast %28 : f32 to vector<32x1xf32>
      %30 = arith.addf %27, %29 : vector<32x1xf32>
      %c2 = arith.constant 2 : index
      %31 = memref.load %arg5[%c2] : memref<6xf32, #tpu.memory_space<smem>>
      %32 = vector.broadcast %31 : f32 to vector<32x1xf32>
      %33 = arith.mulf %18, %32 : vector<32x1xf32>
      %c5 = arith.constant 5 : index
      %34 = memref.load %arg5[%c5] : memref<6xf32, #tpu.memory_space<smem>>
      %35 = vector.broadcast %34 : f32 to vector<32x1xf32>
      %36 = arith.addf %33, %35 : vector<32x1xf32>
      %37 = tpu.concatenate %24, %30, %36 in 1 : vector<32x1xf32>, vector<32x1xf32>, vector<32x1xf32> -> vector<32x3xf32>
      %c0_15 = arith.constant 0 : index
      %c0_16 = arith.constant 0 : index
      %38 = vector.load %arg6[%c0_15, %c0_16] : memref<32x3xf32, #tpu.memory_space<vmem>>, vector<32x3xf32>
      tpu.vector_store %arg6[%c0_15, %c0_16], %37 {strides = array<i32>} : memref<32x3xf32, #tpu.memory_space<vmem>>, vector<32x3xf32>,
    } else {
    }
    return
  }
  func.func @transform_0(%arg0: i32, %arg1: i32) -> (i32, i32) {
    %c0_i32 = arith.constant 0 : i32
    return %arg0, %arg1 : i32, i32
  }
  func.func @transform_1(%arg0: i32, %arg1: i32) -> (i32, i32) {
    %c0_i32 = arith.constant 0 : i32
    %c0_i32_0 = arith.constant 0 : i32
    return %c0_i32, %arg1 : i32, i32
  }
  func.func @transform_2(%arg0: i32, %arg1: i32) -> (i32, i32) {
    %c0_i32 = arith.constant 0 : i32
    %c0_i32_0 = arith.constant 0 : i32
    return %arg0, %c0_i32 : i32, i32
  }
  func.func @transform_3(%arg0: i32, %arg1: i32) -> i32 {
    %c0_i32 = arith.constant 0 : i32
    %c0_i32_0 = arith.constant 0 : i32
    return %c0_i32 : i32
  }
  func.func @transform_4(%arg0: i32, %arg1: i32) -> (i32, i32) {
    %c0_i32 = arith.constant 0 : i32
    %c0_i32_0 = arith.constant 0 : i32
    return %arg0, %c0_i32 : i32, i32
  }
}

</mosaic_0001>

<bundles_post_ra>
// kernel: tpu_custom_call.1
= control target key start
LH: loop header
LB: loop body
LE: loop exit
PB: predicated region body
PF: predicated region fallthrough
CT: control target
= control target key end

     0   :  { %9 = vsyncpa [#allocation4], 0  ;;  %s690_s15 = smov 0   ;;  %s692_s16 = smov 0   ;;  %s783_s0 = inlined_call_operand.vmem [shape: s8[224,256], index: 0, kind: input, shape index: {}]   ;;  %s784_s1 = inlined_call_operand.vmem [shape: f32[1,256], index: 1, kind: input, shape index: {}]   ;;  %s785_s2 = inlined_call_operand.vmem [shape: f32[224,1], index: 2, kind: input, shape index: {}]   ;;  %s786_s3 = inlined_call_operand.vmem [shape: f32[6], index: 3, kind: input, shape index: {}]   ;;  %s787_s4 = inlined_call_operand.vmem [shape: f32[224,3], index: 4, kind: output, shape index: {}]  }
   0x1   :  { %s694_s17 = smov 0  }
   0x2 LB: > { %s558_s18 = sadd.s32 4294967295, %s659_s17   ;;  %s27_s19 = sadd.s32 1, %s655_s16  ;;  %s659_s17 = sphi %s694_s17, %s15_s17   ;;  %s655_s16 = sphi %s692_s16, %s791_s16   ;;  %s651_s15 = sphi %s690_s15, %s790_s15  }
   0x3   : > { %p29_p0 = scmp.ge.s32.totalorder %s27_s19, 7  ;;  %p560_p1 = scmp.ge.s32.totalorder %s659_s17, 1 }
   0x4   : > { %p159_p2 = scmp.lt.s32.totalorder %s659_s17, 8  ;;  %p715_p4 = scmp.eq.s32.totalorder %s558_s18, 0 }
   0x5   : > { %s793_s19 = smov (%p29_p0, %s27_s19), 0  ;;  %s180_s24 = sshll.u32 %s786_s3, 4  ;;  %s181_s24 = int_to_ptr.vmem [resolvable:$true] %s180_s24 }
   0x6   : > { %p711_p3 = pnand %p560_p1, %p159_p2  ;;  %s618_s25 = scalar_lea.vmem %s181_s24, 16 }
   0x7   : > { %p619_p7 = scmp.ne.s32.totalorder %s181_s24, %s618_s25  ;;  %p626_p11 = scmp.lt.s32.totalorder %s181_s24, %s181_s24 }
   0x8   : > { %p584_p5 = pneg %p711_p3  ;;  %p627_p12 = scmp.lt.s32.totalorder %s618_s25, %s618_s25 }
   0xa   : > { %p585_p6 = pnand %p715_p4, %p584_p5  ;;  %p628_p13 = por %p627_p12, %p626_p11 }
   0xc   : > { %p620_p8 = pneg %p585_p6 }
   0xe   : > { %p621_p9 = pnand %p620_p8, %p619_p7 }
  0x10   : > { %p622_p10 = pneg %p621_p9 }
  0x12   : > { %p629_p0 = pnand %p628_p13, %p622_p10 }
  0x14   : > { %632 = shalt.err (!%p629_p0)
}
  0x15   : > { %s661_s26 = smov [#allocation3]   ;;  %215 = sbr.rel (%p711_p3) target bundleno = 341 (0x155), region = 36 }
  0x16   : > { %587 = dma.vmem_to_smem (!%p585_p6), %s181_s24, 16, %s661_s26, [#allocation4]  }
  0x1c   : > { %646 = dma.done.wait (%p715_p4), [#allocation4], 16  }
  0x1d   : > { %648 = vsyncadd (%p715_p4), [#allocation4], 4294967280 }
  0x1e   : > { %221 = sfence }
  0x1f   : > { %p256_p1 = scmp.lt.s32.totalorder %s651_s15, 6  ;;  %v311_v0 = vlaneseq  ;;  %vm286_vm0 = vcmask 7168   ;;  %v662_v1 = vmov 0.0   ;;  %v309_v3 = vld [vmem:[%s784_s1] sm:$0x3]  ;;  %s568_s8 = sshll.u32 %s651_s15, 2 }
  0x20   : > { %287 = vst.msk [vmem:[#allocation2] sm:$0xff] %vm286_vm0, %v662_v1  ;;  %288 = vst.msk [vmem:[#allocation2 + $0x8] sm:$0xff] %vm286_vm0, %v662_v1  ;;  %p271_p2 = scmp.lt.s32.totalorder %s568_s8, 27  ;;  %s573_s10 = sld [smem:[#allocation3 + $0x1]]  ;;  %vm441_vm1 = vcmask 15360   ;;  %vm446_vm2 = vcmask 23552  }
  0x21   : > { %289 = vst.msk [vmem:[#allocation2 + $0x10] sm:$0xff] %vm286_vm0, %v662_v1  ;;  %290 = vst.msk [vmem:[#allocation2 + $0x18] sm:$0xff] %vm286_vm0, %v662_v1  ;;  %s257_s27 = scalar_select %p256_p1, %s651_s15, 6  ;;  %v312_v2 = vshrl.u32 %v311_v0, 7 }
  0x22   : > { %s795_s8 = smov (!%p271_p2, %s568_s8), 27  ;;  %s574_s11 = sld [smem:[#allocation3 + $0x4]] }
  0x23   : > { %s579_s30 = sshll.u32 %s257_s27, 4  ;;  %v313_v4 = vsub.s32 0, %v312_v2  ;;  %v317_v5 = vsub.s32 1, %v312_v2  ;;  %s569_s9 = sshll.u32 %s795_s8, 3 }
  0x24   : > { %s263_s7 = scalar_lea.vmem %s783_s0, %s579_s30  ;;  %s575_s12 = sld [smem:[#allocation3 + $0x2]] }
  0x25   : > { %v291_v6 = vld [vmem:[%s263_s7] sm:$0xff]  ;;  %v292_v7 = vld [vmem:[%s263_s7 + $0x8] sm:$0xff]  ;;  %v314_v8 = vrot.slane %v309_v3, %v313_v4  ;;  %v318_v9 = vrot.slane %v309_v3, %v317_v5  ;;  %s274_s15 = scalar_lea.vmem %s785_s2, %s569_s9  ;;  %s576_s18 = sld [smem:[#allocation3 + $0x5]] }
  0x26   : > { %v293_v10 = vunpack.c.0.s8 %v291_v6  ;;  %v294_v11 = vunpack.c.0.s8 %v292_v7  ;;  %v295_v12 = vunpack.c.1.s8 %v291_v6  ;;  %v296_v13 = vunpack.c.1.s8 %v292_v7  ;;  %v361_v50 = vld [vmem:[%s274_s15] sm:$0xff]  ;;  %v363_v53 = vld [vmem:[%s274_s15 + $0x10] sm:$0xff]  ;;  %v362_v58 = vld [vmem:[%s274_s15 + $0x8] sm:$0xff]  ;;  %s663_s20 = smov 1   ;;  %s664_s21 = smov 2  }
  0x27   : > { %v297_v14 = vunpack.c.2.s8 %v291_v6  ;;  %v298_v15 = vunpack.c.2.s8 %v292_v7  ;;  %v299_v16 = vunpack.c.3.s8 %v291_v6  ;;  %v300_v17 = vunpack.c.3.s8 %v292_v7  ;;  %v329_v38 = vld [vmem:[#allocation2] sm:$0xff]  ;;  %v330_v43 = vld [vmem:[#allocation2 + $0x8] sm:$0xff]  ;;  %v364_v62 = vld [vmem:[%s274_s15 + $0x18] sm:$0xff]  ;;  %s369_s22 = sld [smem:[#allocation3]]  ;;  %s572_s23 = sld [smem:[#allocation3 + $0x3]] }
  0x28   : > { %v301_v18 = vcvt.s32.f32 %v293_v10  ;;  %v302_v19 = vcvt.s32.f32 %v294_v11  ;;  %v303_v20 = vcvt.s32.f32 %v295_v12  ;;  %v304_v21 = vcvt.s32.f32 %v296_v13  ;;  %v331_v39 = vld [vmem:[#allocation2 + $0x10] sm:$0xff]  ;;  %v332_v45 = vld [vmem:[#allocation2 + $0x18] sm:$0xff]  ;;  %s280_s26 = scalar_lea.vmem %s787_s4, %s569_s9 }
  0x29   : > { %v305_v22 = vcvt.s32.f32 %v297_v14  ;;  %v306_v23 = vcvt.s32.f32 %v298_v15  ;;  %v307_v24 = vcvt.s32.f32 %v299_v16  ;;  %v308_v25 = vcvt.s32.f32 %v300_v17 }
  0x2a   : > { %v321_v26 = vmul.f32 %v314_v8, %v301_v18  ;;  %v322_v27 = vmul.f32 %v318_v9, %v302_v19  ;;  %v323_v28 = vmul.f32 %v314_v8, %v303_v20  ;;  %v324_v29 = vmul.f32 %v318_v9, %v304_v21 }
  0x2b   : > { %v325_v30 = vmul.f32 %v314_v8, %v305_v22  ;;  %v326_v31 = vmul.f32 %v318_v9, %v306_v23  ;;  %v327_v32 = vmul.f32 %v314_v8, %v307_v24  ;;  %v328_v33 = vmul.f32 %v318_v9, %v308_v25 }
  0x2c   : > { %v333_v34 = vadd.f32 %v322_v27, %v321_v26  ;;  %v336_v36 = vadd.f32 %v324_v29, %v323_v28  ;;  %v382_v52 = vstv %s573_s10  ;;  %v388_v56 = vstv %s574_s11 }
  0x2d   : > { %v339_v35 = vadd.f32 %v326_v31, %v325_v30  ;;  %v342_v37 = vadd.f32 %v328_v33, %v327_v32  ;;  %v394_v57 = vstv %s575_s12  ;;  %v400_v3 = vstv %s576_s18 }
  0x2e   : > { %334 = vadd.xlane.f32.xlu0 %v333_v34  ;;  %v370_v18 = vstv %s369_s22  ;;  %v376_v20 = vstv %s572_s23 }
  0x2f   : > { %340 = vadd.xlane.f32.xlu1 %v339_v35 }
  0x32   : > { %337 = vadd.xlane.f32.xlu0 %v336_v36 }
  0x33   : > { %343 = vadd.xlane.f32.xlu1 %v342_v37 }
  0xbb   : > { %v335_v40 = vpop.xlane.xlu0 %334 }
  0xbc   : > { %v345_v41 = vadd.f32 %v335_v40, %v329_v38  ;;  %v341_v42 = vpop.xlane.xlu1 %340 }
  0xbd   : > { %v347_v44 = vadd.f32 %v341_v42, %v331_v39 }
  0xbe   : > { %350 = vst.msk [vmem:[#allocation2] sm:$0xff] %vm286_vm0, %v345_v41 }
  0xbf   : > { %v338_v46 = vpop.xlane.xlu0 %337  ;;  %352 = vst.msk [vmem:[#allocation2 + $0x10] sm:$0xff] %vm286_vm0, %v347_v44 }
  0xc0   : > { %v346_v47 = vadd.f32 %v338_v46, %v330_v43  ;;  %v344_v48 = vpop.xlane.xlu1 %343 }
  0xc1   : > { %v348_v49 = vadd.f32 %v344_v48, %v332_v45 }
  0xc2   : > { %351 = vst.msk [vmem:[#allocation2 + $0x8] sm:$0xff] %vm286_vm0, %v346_v47 }
  0xc3   : > { %353 = vst.msk [vmem:[#allocation2 + $0x18] sm:$0xff] %vm286_vm0, %v348_v49 }
  0xc5   : > { %v357_v51 = vld [vmem:[#allocation2] sm:$0xff] }
  0xc6   : > { %v365_v54 = vmul.f32 %v361_v50, %v357_v51  ;;  %v359_v55 = vld [vmem:[#allocation2 + $0x10] sm:$0xff] }
  0xc7   : > { %v367_v60 = vmul.f32 %v363_v53, %v359_v55 }
  0xc8   : > { %v383_v59 = vmul.f32 %v382_v52, %v365_v54  ;;  %v395_v0 = vmul.f32 %v394_v57, %v365_v54  ;;  %v371_v19 = vmul.f32 %v370_v18, %v365_v54 }
  0xc9   : > { %v358_v61 = vld [vmem:[#allocation2 + $0x8] sm:$0xff]  ;;  %v397_v5 = vmul.f32 %v394_v57, %v367_v60  ;;  %v385_v6 = vmul.f32 %v382_v52, %v367_v60  ;;  %v373_v23 = vmul.f32 %v370_v18, %v367_v60 }
  0xca   : > { %v389_v63 = vadd.f32 %v388_v56, %v383_v59  ;;  %v366_v1 = vmul.f32 %v362_v58, %v358_v61  ;;  %v360_v2 = vld [vmem:[#allocation2 + $0x18] sm:$0xff]  ;;  %v401_v8 = vadd.f32 %v400_v3, %v395_v0  ;;  %v377_v22 = vadd.f32 %v376_v20, %v371_v19 }
  0xcb   : > { %v368_v7 = vmul.f32 %v364_v62, %v360_v2  ;;  %v403_v10 = vadd.f32 %v400_v3, %v397_v5  ;;  %v391_v11 = vadd.f32 %v388_v56, %v385_v6  ;;  %v379_v28 = vadd.f32 %v376_v20, %v373_v23 }
  0xcc   : > { %409 = vrot.lane.b32.xlu0 %v389_v63, %s663_s20  ;;  %v384_v4 = vmul.f32 %v382_v52, %v366_v1  ;;  %v396_v14 = vmul.f32 %v394_v57, %v366_v1  ;;  %v372_v32 = vmul.f32 %v370_v18, %v366_v1 }
  0xcd   : > { %v386_v12 = vmul.f32 %v382_v52, %v368_v7  ;;  %v398_v16 = vmul.f32 %v394_v57, %v368_v7  ;;  %v374_v36 = vmul.f32 %v370_v18, %v368_v7 }
  0xce   : > { %v390_v9 = vadd.f32 %v388_v56, %v384_v4  ;;  %v402_v15 = vadd.f32 %v400_v3, %v396_v14  ;;  %v378_v35 = vadd.f32 %v376_v20, %v372_v32 }
  0xcf   : > { %v392_v13 = vadd.f32 %v388_v56, %v386_v12  ;;  %v404_v17 = vadd.f32 %v400_v3, %v398_v16  ;;  %v380_v40 = vadd.f32 %v376_v20, %v374_v36 }
  0xd0   : > { %425 = vrot.lane.b32.xlu0 %v401_v8, %s664_s21  ;;  %411 = vrot.lane.b32.xlu1 %v390_v9, %s663_s20 }
  0xd4   : > { %429 = vrot.lane.b32.xlu0 %v403_v10, %s664_s21  ;;  %413 = vrot.lane.b32.xlu1 %v391_v11, %s663_s20 }
  0xd8   : > { %415 = vrot.lane.b32.xlu1 %v392_v13, %s663_s20 }
  0xdc   : > { %427 = vrot.lane.b32.xlu1 %v402_v15, %s664_s21 }
  0xe0   : > { %431 = vrot.lane.b32.xlu1 %v404_v17, %s664_s21 }
 0x13e   : > { %v410_v21 = vpop.permute.xlu0 %409 }
 0x13f   : > { %v437_v24 = vsel %vm286_vm0, %v377_v22, %v410_v21 }
 0x142   : > { %v412_v25 = vpop.permute.xlu1 %411  ;;  %v426_v26 = vpop.permute.xlu0 %425 }
 0x143   : > { %v442_v27 = vsel %vm441_vm1, %v437_v24, %v426_v26  ;;  %v438_v37 = vsel %vm286_vm0, %v378_v35, %v412_v25 }
 0x144   : > { %447 = vst.msk [vmem:[%s280_s26] sm:$0xff] %vm446_vm2, %v442_v27 }
 0x146   : > { %v414_v29 = vpop.permute.xlu1 %413  ;;  %v430_v30 = vpop.permute.xlu0 %429 }
 0x147   : > { %v439_v31 = vsel %vm286_vm0, %v379_v28, %v414_v29 }
 0x148   : > { %v444_v33 = vsel %vm441_vm1, %v439_v31, %v430_v30 }
 0x149   : > { %449 = vst.msk [vmem:[%s280_s26 + $0x10] sm:$0xff] %vm446_vm2, %v444_v33 }
 0x14a   : > { %v416_v34 = vpop.permute.xlu1 %415 }
 0x14b   : > { %v440_v41 = vsel %vm286_vm0, %v380_v40, %v416_v34 }
 0x14e   : > { %v428_v38 = vpop.permute.xlu1 %427 }
 0x14f   : > { %v443_v39 = vsel %vm441_vm1, %v438_v37, %v428_v38 }
 0x150   : > { %448 = vst.msk [vmem:[%s280_s26 + $0x8] sm:$0xff] %vm446_vm2, %v443_v39 }
 0x152   : > { %v432_v42 = vpop.permute.xlu1 %431 }
 0x153   : > { %v445_v43 = vsel %vm441_vm1, %v440_v41, %v432_v42 }
 0x154   : > { %450 = vst.msk [vmem:[%s280_s26 + $0x18] sm:$0xff] %vm446_vm2, %v445_v43 }
 0x155 PF: > { %s15_s17 = sadd.s32 1, %s659_s17   ;;  %s790_s15 = smov %s655_s16 }
 0x156   : > { %p12_p3 = scmp.ge.s32.totalorder %s15_s17, 9   ;;  %s791_s16 = smov %s793_s19 }
 0x158   :  { %14 = sbr.rel (!%p12_p3) target bundleno = 2 (0x2), region = 85 }
 0x15f   :  { %473 = vsyncpa [#allocation4], 1 }
 0x160   :  { %475 = vsyncpa [#allocation4 + $0x1], 1 }

</bundles_post_ra>
